<compile_context>
chip_gen: v5e
topology: v5e:2x2
jax: 0.10.0
libtpu: 0.0.40
codegen_flags: <defaults>
</compile_context>

<pallas_src>
import functools

import jax
import jax.numpy as jnp
from jax.experimental import pallas as pl
from jax.experimental.pallas import tpu as pltpu


def _round_up(x, m):
    return (x + m - 1) // m * m


def _cosface_lse_kernel(label_ref, x_ref, lse_ref, l_scr, *,
                        scaling, margin, num_classes, class_tiles_full):
    # label_ref: [b_tile, 1] int32 (VMEM)
    # x_ref:     [b_tile, c_tile] cosine block (f32 or bf16; upcast below)
    # lse_ref:   [b_tile, 1] f32 per-row logsumexp of the CosFace logits
    # l_scr:     [b_tile, 1] f32 running exp-sum (relative to static max=scaling)
    ci = pl.program_id(1)
    nc = pl.num_programs(1)
    b_tile, c_tile = x_ref.shape

    @pl.when(ci == 0)
    def _init():
        l_scr[...] = jnp.zeros(l_scr.shape, l_scr.dtype)

    x = x_ref[...].astype(jnp.float32)                       # [b_tile, c_tile]

    # Block-local label column: avoids adding ci*c_tile to a full-tile iota.
    local_label = label_ref[...] - ci * c_tile               # [b_tile, 1]
    col = jax.lax.broadcasted_iota(jnp.int32, (b_tile, c_tile), 1)
    onehot = col == local_label                              # label lane per row

    # z = scaling*(cos - margin*onehot) - scaling.
    # Static max m = scaling is valid because the input is a cosine (|x| <= 1),
    # so every (possibly margin-shifted) scaled logit is <= scaling.
    z = x * scaling - jnp.where(onehot, scaling * (1.0 + margin), scaling)

    if not class_tiles_full:
        # Edge C-block: mask lanes past the real class count (garbage data).
        valid = col < (num_classes - ci * c_tile)
        z = jnp.where(valid, z, -jnp.inf)

    l_scr[...] += jnp.sum(jnp.exp(z), axis=-1, keepdims=True)

    @pl.when(ci == nc - 1)
    def _finalize():
        # Rows past the real batch (edge B-block) hold garbage; Pallas's
        # bounds-masked output store drops them, so no extra masking needed.
        lse_ref[...] = (scaling + jnp.log(l_scr[...])).astype(lse_ref.dtype)


def cosface_loss(cosine, label, *, scaling, margin, gamma=1,
                 b_tile=256, c_tile=2048):
    """CosFaceLoss forward.

    cosine: (B, C) float32 or bfloat16 cosine similarities in [-1, 1]
            (bf16 recommended for large C: halves HBM traffic, math stays f32).
    label:  (B,) int class indices, assumed in-range [0, C).
    Returns the scalar focal-weighted cross-entropy loss.
    """
    B, C = cosine.shape

    # Lane-dense class tiles (multiple of 128), no bigger than needed.
    c_tile = _round_up(min(c_tile, _round_up(C, 128)), 128)
    # Batch tiles at sublane granularity; ensure >= 2 tiles on the parallel B
    # axis when B allows so both v7x TensorCores get work.
    sub = 16 if cosine.dtype == jnp.bfloat16 else 8
    b_tile = min(b_tile, _round_up(pl.cdiv(B, 2), sub))
    b_tile = _round_up(max(b_tile, sub), sub)

    grid = (pl.cdiv(B, b_tile), pl.cdiv(C, c_tile))

    # Only the tiny label vector gets reshaped; the (B, C) matrix is consumed
    # unpadded in its native layout (no extra HBM round trip).
    lab = label.astype(jnp.int32).reshape(B, 1)

    kern = functools.partial(
        _cosface_lse_kernel,
        scaling=float(scaling),
        margin=float(margin),
        num_classes=C,
        class_tiles_full=(C % c_tile == 0),
    )

    # Explicit scoped-VMEM budget: double-buffered input + f32 temporaries,
    # clamped so it stays safe on every generation (v7x physical = 64 MiB).
    in_block = b_tile * c_tile * cosine.dtype.itemsize
    f32_block = b_tile * c_tile * 4
    vmem_limit = int(min(64 * 2**20, max(32 * 2**20, 2 * in_block + 6 * f32_block)))

    cost = pl.CostEstimate(
        flops=4 * B * C,
        transcendentals=B * C,
        bytes_accessed=B * C * cosine.dtype.itemsize + 2 * B * 4,
    )

    lse = pl.pallas_call(
        kern,
        out_shape=jax.ShapeDtypeStruct((B, 1), jnp.float32),
        grid_spec=pltpu.PrefetchScalarGridSpec(
            num_scalar_prefetch=0,
            grid=grid,
            in_specs=[
                pl.BlockSpec((b_tile, 1), lambda bi, ci: (bi, 0)),
                pl.BlockSpec((b_tile, c_tile), lambda bi, ci: (bi, ci)),
            ],
            out_specs=pl.BlockSpec((b_tile, 1), lambda bi, ci: (bi, 0)),
            scratch_shapes=[pltpu.VMEM((b_tile, 1), jnp.float32)],
        ),
        compiler_params=pltpu.CompilerParams(
            dimension_semantics=("parallel", "arbitrary"),
            vmem_limit_bytes=vmem_limit,
        ),
        cost_estimate=cost,
    )(lab, cosine)[:, 0]

    # O(B) epilogue in plain JAX: target-logit gather + cross entropy + focal.
    t = (cosine[jnp.arange(B), label].astype(jnp.float32) - margin) * scaling
    ce = lse - t
    p = jnp.exp(-ce)
    if gamma == 0:
        focal = ce
    elif isinstance(gamma, int) and gamma > 0:
        w = 1.0 - p
        for _ in range(gamma - 1):                 # static unroll, no pow
            w = w * (1.0 - p)
        focal = w * ce
    else:
        ce_c = jnp.maximum(ce, 0.0)                # guard fractional pow vs tiny neg
        focal = (1.0 - jnp.exp(-ce_c)) ** gamma * ce_c
    return jnp.mean(focal)


def _reference(cosine, label, scaling, margin, gamma=1):
    """Pure-JAX transcription of the PyTorch CosFaceLoss forward."""
    B = cosine.shape[0]
    cosine = cosine.astype(jnp.float32)
    target = cosine[jnp.arange(B), label] - margin
    logits = cosine.at[jnp.arange(B), label].set(target) * scaling
    lse = jax.nn.logsumexp(logits, axis=-1)
    ce = lse - target * scaling
    p = jnp.exp(-ce)
    return jnp.mean((1.0 - p) ** gamma * ce)


if __name__ == "__main__":
    # CosFaceLoss(scaling=30.0, margin=0.35, use_focal=True) -> FocalLoss(gamma=1)
    scaling, margin = 30.0, 0.35
    B, C = 10, 300  # deliberately not multiples of 8 / 128: exercises edge blocks

    key = jax.random.PRNGKey(0)
    k1, k2 = jax.random.split(key)
    cosine = jax.random.uniform(k1, (B, C), minval=-1.0, maxval=1.0,
                                dtype=jnp.float32)
    label = jax.random.randint(k2, (B,), 0, C, dtype=jnp.int32)

    # Small tiles -> 2 B-tiles x 3 C-tiles grid: exercises the streaming
    # class reduction and the masked edge blocks (no wrapper-side padding).
    out = cosface_loss(cosine, label, scaling=scaling, margin=margin,
                       b_tile=8, c_tile=128)
    out = jax.block_until_ready(out)
    ref = _reference(cosine, label, scaling, margin)
    assert jnp.allclose(out, ref, atol=1e-4, rtol=1e-4), (out, ref)

    # Default tiles (single block per axis at this size).
    out_d = cosface_loss(cosine, label, scaling=scaling, margin=margin)
    out_d = jax.block_until_ready(out_d)
    assert jnp.allclose(out_d, ref, atol=1e-4, rtol=1e-4), (out_d, ref)

    # bf16-in-HBM path (recommended default: halves HBM traffic; math stays f32).
    cos_bf16 = cosine.astype(jnp.bfloat16)
    out_bf16 = cosface_loss(cos_bf16, label, scaling=scaling, margin=margin)
    out_bf16 = jax.block_until_ready(out_bf16)
    ref_bf16 = _reference(cos_bf16.astype(jnp.float32), label, scaling, margin)
    assert jnp.allclose(out_bf16, ref_bf16, atol=5e-3, rtol=5e-3), (out_bf16, ref_bf16)

    print("KERNEL_OK")
</pallas_src>

<mosaic_0001>
module attributes {stable_mosaic.version = 11 : i64} {
  func.func @_cosface_lse_kernel(%arg0: i32, %arg1: i32, %arg2: memref<8x1xi32, #tpu.memory_space<vmem>>, %arg3: memref<8x128xf32, #tpu.memory_space<vmem>>, %arg4: memref<8x1xf32, #tpu.memory_space<vmem>>, %arg5: memref<8x1xf32, #tpu.memory_space<vmem>>) attributes {dimension_semantics = [#tpu.dimension_semantics<parallel>, #tpu.dimension_semantics<arbitrary>], iteration_bounds = array<i64: 2, 3>, scalar_prefetch = 0 : i64, scratch_operands = 1 : i64, tpu.core_type = #tpu.core_type<tc>, window_params = [{transform_indices = @transform_0, window_bounds = array<i64: 8, 1>}, {transform_indices = @transform_1, window_bounds = array<i64: 8, 128>}, {transform_indices = @transform_2, window_bounds = array<i64: 8, 1>}]} {
    %c0_i32 = arith.constant 0 : i32
    %0 = arith.cmpi eq, %arg1, %c0_i32 : i32
    %1 = arith.extui %0 : i1 to i32
    %c0_i32_0 = arith.constant 0 : i32
    %2 = arith.cmpi ne, %1, %c0_i32_0 : i32
    scf.if %2 {
      %cst_14 = arith.constant 0.000000e+00 : f32
      %32 = vector.broadcast %cst_14 : f32 to vector<8x1xf32>
      %c0_15 = arith.constant 0 : index
      %c0_16 = arith.constant 0 : index
      %33 = vector.load %arg5[%c0_15, %c0_16] : memref<8x1xf32, #tpu.memory_space<vmem>>, vector<8x1xf32>
      tpu.vector_store %arg5[%c0_15, %c0_16], %32 {strides = array<i32>} : memref<8x1xf32, #tpu.memory_space<vmem>>, vector<8x1xf32>,
    } else {
    }
    %c0 = arith.constant 0 : index
    %c0_1 = arith.constant 0 : index
    %3 = vector.load %arg3[%c0, %c0_1] : memref<8x128xf32, #tpu.memory_space<vmem>>, vector<8x128xf32>
    %c0_2 = arith.constant 0 : index
    %c0_3 = arith.constant 0 : index
    %4 = vector.load %arg2[%c0_2, %c0_3] : memref<8x1xi32, #tpu.memory_space<vmem>>, vector<8x1xi32>
    %c128_i32 = arith.constant 128 : i32
    %5 = arith.muli %arg1, %c128_i32 : i32
    %6 = vector.broadcast %5 : i32 to vector<8x1xi32>
    %7 = arith.subi %4, %6 : vector<8x1xi32>
    %8 = tpu.iota {dimensions = array<i32: 1>} : vector<8x128xi32>
    %9 = vector.broadcast %7 : vector<8x1xi32> to vector<8x128xi32>
    %10 = arith.cmpi eq, %8, %9 : vector<8x128xi32>
    %cst = arith.constant 3.000000e+01 : f32
    %11 = vector.broadcast %cst : f32 to vector<8x128xf32>
    %12 = arith.mulf %3, %11 : vector<8x128xf32>
    %cst_4 = arith.constant 4.050000e+01 : f32
    %cst_5 = arith.constant 3.000000e+01 : f32
    %13 = vector.broadcast %cst_4 : f32 to vector<8x128xf32>
    %14 = vector.broadcast %cst_5 : f32 to vector<8x128xf32>
    %15 = arith.select %10, %13, %14 : vector<8x128xi1>, vector<8x128xf32>
    %16 = arith.subf %12, %15 : vector<8x128xf32>
    %c128_i32_6 = arith.constant 128 : i32
    %17 = arith.muli %arg1, %c128_i32_6 : i32
    %c300_i32 = arith.constant 300 : i32
    %18 = arith.subi %c300_i32, %17 : i32
    %19 = vector.broadcast %18 : i32 to vector<8x128xi32>
    %20 = arith.cmpi slt, %8, %19 : vector<8x128xi32>
    %cst_7 = arith.constant 0xFF800000 : f32
    %21 = vector.broadcast %cst_7 : f32 to vector<8x128xf32>
    %22 = arith.select %20, %16, %21 : vector<8x128xi1>, vector<8x128xf32>
    %c0_8 = arith.constant 0 : index
    %c0_9 = arith.constant 0 : index
    %23 = vector.load %arg5[%c0_8, %c0_9] : memref<8x1xf32, #tpu.memory_space<vmem>>, vector<8x1xf32>
    %24 = math.exp %22 : vector<8x128xf32>
    %cst_10 = arith.constant dense<0.000000e+00> : vector<8xf32>
    %25 = vector.multi_reduction <add>, %24, %cst_10 [1] : vector<8x128xf32> to vector<8xf32>
    %26 = vector.shape_cast %25 : vector<8xf32> to vector<8x1xf32>
    %27 = arith.addf %23, %26 : vector<8x1xf32>
    %c0_11 = arith.constant 0 : index
    %c0_12 = arith.constant 0 : index
    %28 = vector.load %arg5[%c0_11, %c0_12] : memref<8x1xf32, #tpu.memory_space<vmem>>, vector<8x1xf32>
    tpu.vector_store %arg5[%c0_11, %c0_12], %27 {strides = array<i32>} : memref<8x1xf32, #tpu.memory_space<vmem>>, vector<8x1xf32>,
    %c2_i32 = arith.constant 2 : i32
    %29 = arith.cmpi eq, %arg1, %c2_i32 : i32
    %30 = arith.extui %29 : i1 to i32
    %c0_i32_13 = arith.constant 0 : i32
    %31 = arith.cmpi ne, %30, %c0_i32_13 : i32
    scf.if %31 {
      %c0_14 = arith.constant 0 : index
      %c0_15 = arith.constant 0 : index
      %32 = vector.load %arg5[%c0_14, %c0_15] : memref<8x1xf32, #tpu.memory_space<vmem>>, vector<8x1xf32>
      %33 = math.log %32 : vector<8x1xf32>
      %cst_16 = arith.constant 3.000000e+01 : f32
      %34 = vector.broadcast %cst_16 : f32 to vector<8x1xf32>
      %35 = arith.addf %34, %33 : vector<8x1xf32>
      %c0_17 = arith.constant 0 : index
      %c0_18 = arith.constant 0 : index
      %36 = vector.load %arg4[%c0_17, %c0_18] : memref<8x1xf32, #tpu.memory_space<vmem>>, vector<8x1xf32>
      tpu.vector_store %arg4[%c0_17, %c0_18], %35 {strides = array<i32>} : memref<8x1xf32, #tpu.memory_space<vmem>>, vector<8x1xf32>,
    } else {
    }
    return
  }
  func.func @transform_0(%arg0: i32, %arg1: i32) -> (i32, i32) {
    %c0_i32 = arith.constant 0 : i32
    %c0_i32_0 = arith.constant 0 : i32
    return %arg0, %c0_i32 : i32, i32
  }
  func.func @transform_1(%arg0: i32, %arg1: i32) -> (i32, i32) {
    %c0_i32 = arith.constant 0 : i32
    return %arg0, %arg1 : i32, i32
  }
  func.func @transform_2(%arg0: i32, %arg1: i32) -> (i32, i32) {
    %c0_i32 = arith.constant 0 : i32
    %c0_i32_0 = arith.constant 0 : i32
    return %arg0, %c0_i32 : i32, i32
  }
}

</mosaic_0001>

<bundles_post_ra>
// kernel: tpu_custom_call.1
= control target key start
LH: loop header
LB: loop body
LE: loop exit
PB: predicated region body
PF: predicated region fallthrough
CT: control target
= control target key end

     0   :  { %7 = vsyncpa [#allocation4], 0  ;;  %s658_s0 = inlined_call_operand.vmem [shape: s32[10,1], index: 0, kind: input, shape index: {}]   ;;  %s659_s1 = inlined_call_operand.hbm [shape: f32[10,300], index: 1, kind: input, shape index: {}]   ;;  %s660_s2 = inlined_call_operand.vmem [shape: f32[10,1], index: 2, kind: output, shape index: {}]  }
   0x1   :  { %9 = vsyncpa [#allocation4 + $0x1], 0  ;;  %s536_s9 = smov 0   ;;  %s538_s10 = smov 0  }
   0x2   :  { %s540_s11 = smov 0   ;;  %s542_s12 = smov 0  }
   0x3   :  { %s544_s13 = smov 0   ;;  %s546_s14 = smov 0  }
   0x4   :  { %s548_s15 = smov 0   ;;  %s550_s16 = smov 0  }
   0x5 LB: > { %s325_s17 = sadd.s32 4294967295, %s516_s16   ;;  %s24_s18 = sadd.s32 1, %s508_s14  ;;  %s516_s16 = sphi %s550_s16, %s15_s16   ;;  %s512_s15 = sphi %s548_s15, %s669_s15   ;;  %s508_s14 = sphi %s546_s14, %s668_s14   ;;  %s504_s13 = sphi %s544_s13, %s667_s13   ;;  %s500_s12 = sphi %s542_s12, %s666_s12   ;;  %s496_s11 = sphi %s540_s11, %s665_s11   ;;  %s492_s10 = sphi %s538_s10, %s664_s10   ;;  %s488_s9 = sphi %s536_s9, %s663_s9  }
   0x6   : > { %p25_p0 = scmp.ge.s32.totalorder %s24_s18, 3  ;;  %s27_s19 = sadd.s32 1, %s512_s15 }
   0x7   : > { %s62_s20 = sadd.s32 1, %s496_s11  ;;  %p69_p1 = scmp.ne.s32.totalorder %s496_s11, %s492_s10 }
   0x8   : > { %s671_s18 = smov (%p25_p0, %s24_s18), 0  ;;  %s673_s19 = smov (!%p25_p0, %s27_s19), %s512_s15 }
   0x9   : > { %s58_s21 = ssub.s32 %s508_s14, %s671_s18  ;;  %p70_p2 = scmp.eq.s32.totalorder %s516_s16, 0 }
   0xa   : > { %p29_p3 = scmp.ge.s32.totalorder %s673_s19, 2  ;;  %p75_p4 = scmp.ne.s32.totalorder %s492_s10, %s488_s9 }
   0xb   : > { %p587_p5 = por %p70_p2, %p69_p1  ;;  %p76_p6 = scmp.eq.s32.totalorder %s325_s17, 0 }
   0xc   : > { %s675_s19 = smov (%p29_p3, %s673_s19), 0  ;;  %p347_p8 = scmp.lt.s32.totalorder %s516_s16, 6 }
   0xd   : > { %p593_p7 = por %p76_p6, %p75_p4  ;;  %s57_s24 = ssub.s32 %s512_s15, %s675_s19 }
   0xe   : > { %s59_s25 = sor.u32 %s58_s21, %s57_s24  ;;  %s132_s26 = sand.u32 1, %s496_s11  }
   0xf   : > { %p60_p9 = scmp.eq.s32.totalorder %s59_s25, 0  ;;  %s329_s27 = sshll.u32 %s132_s26, 3 }
  0x10   : > { %s340_s28 = smul.u32 3, %s512_s15  ;;  %s136_s4 = scalar_lea.vmem [#allocation3], %s329_s27 }
  0x11   : > { %s603_s29 = scalar_select %p60_p9, %s496_s11, %s62_s20  }
  0x12   : > { %s140_s30 = sadd.s32 %s508_s14, %s340_s28  ;;  %s146_s5 = sshll.u32 %s136_s4, 4  ;;  %s147_s5 = int_to_ptr.vmem [resolvable:$true] %s146_s5 }
  0x13   : > { %s330_s3 = sshll.u32 %s140_s30, 3  ;;  %p344_p10 = pnand %p347_p8, %p587_p5 }
  0x14   : > { %s142_s8 = scalar_lea.hbm %s659_s1, %s330_s3  ;;  %p331_p11 = scmp.ge.s32.totalorder %s516_s16, 1 }
  0x15   : > { %s144_s9 = sshll.u32 %s142_s8, 4  ;;  %p151_p12 = scmp.lt.s32.totalorder %s516_s16, 7  ;;  %s145_s9 = int_to_ptr.hbm [resolvable:$true] %s144_s9 }
  0x16   : > { %s133_s17 = scalar_lea.sflag [#allocation4], %s132_s26 }
  0x17   : > { %346 = dma.hbm_to_vmem [thread:$0]  (!%p344_p10), %s145_s9, 128, %s147_s5, %s133_s17  }
  0x18   : > { %p152_p13 = pnand %p331_p11, %p151_p12 }
  0x19   : > { %s157_s20 = sand.u32 (!%p152_p13), 1, %s492_s10  }
  0x1a   : > { %155 = sbr.rel (%p152_p13) target bundleno = 312 (0x138), region = 28  ;;  %s332_s21 = sshll.u32 (!%p152_p13), %s157_s20, 3 }
  0x1b   : > { %s158_s24 = scalar_lea.sflag (!%p152_p13), [#allocation4], %s157_s20  ;;  %s161_s25 = scalar_lea.vmem (!%p152_p13), [#allocation3], %s332_s21 }
  0x1f   : > { %483 = dma.done.wait (%p593_p7), %s158_s24, 128  }
  0x20   : > { %485 = vsyncadd (%p593_p7), %s158_s24, 4294967168  ;;  %p186_p0 = scmp.lt.s32.totalorder %s504_s13, 1  ;;  %p335_p1 = scmp.ne.s32.totalorder %s500_s12, 0 }
  0x22   : > { %s677_s13 = smov (!%p186_p0, %s504_s13), 1  ;;  %197 = sbr.rel (%p335_p1) target bundleno = 41 (0x29), region = 36 }
  0x23   : > { %s333_s22 = sshll.u32 %s677_s13, 3 }
  0x24   : > { %s189_s28 = scalar_lea.vmem %s658_s0, %s333_s22  ;;  %s628_s4 = scalar_lea.vmem %s660_s2, %s333_s22 }
  0x27   : > { %vm198_vm0 = vcmask 7168   ;;  %v518_v0 = vmov 0.0  }
  0x28   : > { %199 = vst.msk [vmem:[#allocation2] sm:$0xff] %vm198_vm0, %v518_v0 }
  0x29 PF: > { %v201_v1 = vld [vmem:[%s189_s28] sm:$0xff]  ;;  %s336_s23 = sshll.u32 %s500_s12, 7  ;;  %v519_v2 = vmov 0   ;;  %v205_v5 = vlaneseq  ;;  %v200_v6 = vld [vmem:[%s161_s25] sm:$0xff]  ;;  %v520_v11 = vmov 30.0   ;;  %vm224_vm3 = vcmask 7168  }
  0x2a   : > { %415 = vset.pattern.permute.xlu0 %v519_v2  ;;  %v203_v3 = vstv %s336_s23  ;;  %s214_s13 = ssub.s32 300, %s336_s23  ;;  %v211_v9 = vmul.f32 30.0, %v200_v6  ;;  %p337_p2 = scmp.ne.s32.totalorder %s500_s12, 2 }
  0x2b   : > { %v204_v4 = vsub.s32 %v201_v1, %v203_v3  ;;  %v206_v7 = vand.u32 127, %v205_v5  ;;  %v215_v8 = vstv %s214_s13 }
  0x2d   : > { %208 = vperm.xlu0 %415, %v204_v4   ;;  %vm216_vm2 = vcmp.lt.s32.totalorder %v206_v7, %v215_v8 }
  0x2f   : > { %v218_v17 = vld [vmem:[#allocation2] sm:$0xff] }
  0x9f   : > { %v209_v10 = vpop.permute.xlu0 %208 }
  0xa0   : > { %vm210_vm1 = vcmp.eq.s32.totalorder %v206_v7, %v209_v10 }
  0xa1   : > { %v212_v12 = vsel %vm210_vm1, 40.5, %v520_v11 }
  0xa2   : > { %v213_v13 = vsub.f32 %v211_v9, %v212_v12 }
  0xa4   : > { %v217_v14 = vsel %vm216_vm2, %v213_v13, -inf }
  0xa5   : > { %v219_v15 = vmul.f32 1.442695, %v217_v14 }
  0xa7   : > { %416 = vpow2.f32 %v219_v15 }
  0xad   : > { %v417_v16 = vpop.eup %416 }
  0xae   : > { %221 = vadd.xlane.f32.xlu0 %v417_v16 }
 0x120   : > { %229 = sbr.rel (%p337_p2) target bundleno = 312 (0x138), region = 40 }
 0x121   : > { %v222_v18 = vpop.xlane.xlu0 %221 }
 0x122   : > { %v223_v19 = vadd.f32 %v222_v18, %v218_v17 }
 0x124   : > { %225 = vst.msk [vmem:[#allocation2] sm:$0xff] %vm224_vm3, %v223_v19 }
 0x12b   : > { %v230_v20 = vld [vmem:[#allocation2] sm:$0xff] }
 0x12c   : > { %418 = vlog2.f32 %v230_v20 }
 0x132   : > { %v419_v21 = vpop.eup %418 }
 0x133   : > { %v232_v22 = vmul.f32 0.6931472, %v419_v21 }
 0x135   : > { %v233_v23 = vadd.f32 30.0, %v232_v22 }
 0x137   : > { %234 = vst.msk [vmem:[%s628_s4] sm:$0xff] %vm224_vm3, %v233_v23 }
 0x138 PF: > { %s15_s16 = sadd.s32 1, %s516_s16   ;;  %s663_s9 = smov %s492_s10 }
 0x139   : > { %p12_p3 = scmp.ge.s32.totalorder %s15_s16, 8   ;;  %s664_s10 = smov %s496_s11 }
 0x13a   : > { %s665_s11 = smov %s603_s29  ;;  %s666_s12 = smov %s508_s14 }
 0x13b   : > { %s667_s13 = smov %s512_s15  ;;  %s668_s14 = smov %s671_s18 }
 0x13c   : > { %s669_s15 = smov %s675_s19  ;;  %14 = sbr.rel (!%p12_p3) target bundleno = 5 (0x5), region = 79 }
 0x141   :  { %254 = vsyncpa [#allocation4], 1 }
 0x142   :  { %256 = vsyncpa [#allocation4 + $0x1], 1 }

</bundles_post_ra>
